<compile_context>
chip_gen: v6e
topology: v6e:2x2x1
jax: 0.10.0
libtpu: 0.0.40
codegen_flags: <defaults>
</compile_context>

<pallas_src>
import math

import jax
import jax.numpy as jnp
from jax.experimental import pallas as pl
from jax.experimental.pallas import tpu as pltpu


def _feature_classifier_kernel(x_ref, w_ref, b_ref, o_ref):
    # x_ref: (TB, D)  VMEM tile of the batch
    # w_ref: (C, D)   resident weight (PyTorch layout: out_features x in_features)
    # b_ref: (C, 1)   resident bias
    # o_ref: (C, TB)  lane-dense output block (batch along lanes)
    x = x_ref[...]
    w = w_ref[...]
    # (C, D) . (TB, D) contracting D  ->  (C, TB); output lanes = batch.
    logits = jax.lax.dot_general(
        w, x,
        dimension_numbers=(((1,), (1,)), ((), ())),
        preferred_element_type=jnp.float32,
    )
    logits = logits + b_ref[...]                      # broadcast bias over lanes
    o_ref[...] = jax.nn.sigmoid(logits).astype(o_ref.dtype)


def _round_up(a, m):
    return ((a + m - 1) // m) * m


def feature_classifier_forward(x, weight, bias, *, tb_target=None):
    """sigmoid(x @ weight.T + bias).

    x:      (B, D) float32
    weight: (C, D) float32   (same layout as torch nn.Linear.weight)
    bias:   (C,)   float32
    returns (B, C) float32
    """
    B, D = x.shape
    C = weight.shape[0]
    itemsize = jnp.dtype(x.dtype).itemsize

    # Pick a batch tile: aim for ~4 MiB per x tile (multiple of 128 so the
    # lane-dense output block is aligned), capped so double-buffered tiles stay
    # far below v7x's 32 MiB scoped-VMEM default.
    if tb_target is None:
        bytes_per_row = D * itemsize
        tb_target = (4 * 1024 * 1024 // bytes_per_row) // 128 * 128
        tb_target = max(128, min(2048, tb_target))

    if B <= tb_target:
        TB = _round_up(B, 128)
        B_pad = TB
    else:
        TB = tb_target
        B_pad = _round_up(B, TB)

    if B_pad != B:
        # Pad the batch; padded rows produce sigmoid(bias) and are sliced off.
        x = jnp.pad(x, ((0, B_pad - B), (0, 0)))

    bias2d = bias.reshape(C, 1)
    num_tiles = B_pad // TB

    cost = pl.CostEstimate(
        flops=2 * B_pad * D * C,
        transcendentals=B_pad * C,
        bytes_accessed=itemsize * (B_pad * D + C * D + C + B_pad * C),
    )

    out_cb = pl.pallas_call(
        _feature_classifier_kernel,
        out_shape=jax.ShapeDtypeStruct((C, B_pad), x.dtype),
        grid_spec=pltpu.PrefetchScalarGridSpec(
            num_scalar_prefetch=0,
            grid=(num_tiles,),
            in_specs=[
                pl.BlockSpec((TB, D), lambda i: (i, 0)),   # batch tile of x
                pl.BlockSpec((C, D), lambda i: (0, 0)),    # weight, resident
                pl.BlockSpec((C, 1), lambda i: (0, 0)),    # bias, resident
            ],
            out_specs=pl.BlockSpec((C, TB), lambda i: (0, i)),  # lane-dense
        ),
        compiler_params=pltpu.CompilerParams(
            dimension_semantics=("parallel",),  # batch tiles are independent
        ),
        cost_estimate=cost,
    )(x, weight, bias2d)

    # (C, B_pad) -> (B, C); cheap wrapper-side layout plumbing.
    return out_cb.T[:B]


def init_params(latent_dim, n_classes, key):
    """Match nn.Linear default init: uniform(-1/sqrt(D), 1/sqrt(D))."""
    kw, kb = jax.random.split(key)
    bound = 1.0 / math.sqrt(latent_dim)
    weight = jax.random.uniform(
        kw, (n_classes, latent_dim), minval=-bound, maxval=bound, dtype=jnp.float32
    )
    bias = jax.random.uniform(
        kb, (n_classes,), minval=-bound, maxval=bound, dtype=jnp.float32
    )
    return weight, bias


if __name__ == "__main__":
    key = jax.random.PRNGKey(0)
    k_x, k_p = jax.random.split(key)

    batch = 8
    latent_dim = 32
    n_classes = 4

    x = jax.random.normal(k_x, (batch, latent_dim), dtype=jnp.float32)
    weight, bias = init_params(latent_dim, n_classes, k_p)

    out = feature_classifier_forward(x, weight, bias)
    out = jax.block_until_ready(out)

    # Reference: same math as FeatureClassifier.forward (Linear + Sigmoid).
    ref = jax.nn.sigmoid(x @ weight.T + bias[None, :])
    assert out.shape == (batch, n_classes)
    assert jnp.allclose(out, ref, atol=1e-5, rtol=1e-5)

    print("KERNEL_OK")
</pallas_src>

<mosaic_0001>
module attributes {stable_mosaic.version = 11 : i64} {
  func.func @_feature_classifier_kernel(%arg0: i32, %arg1: memref<128x32xf32, #tpu.memory_space<vmem>>, %arg2: memref<4x32xf32, #tpu.memory_space<vmem>>, %arg3: memref<4x1xf32, #tpu.memory_space<vmem>>, %arg4: memref<4x128xf32, #tpu.memory_space<vmem>>) attributes {dimension_semantics = [#tpu.dimension_semantics<parallel>], iteration_bounds = array<i64: 1>, scalar_prefetch = 0 : i64, scratch_operands = 0 : i64, tpu.core_type = #tpu.core_type<tc>, window_params = [{transform_indices = @transform_0, window_bounds = array<i64: 128, 32>}, {pipeline_mode = #tpu.pipeline_mode<synchronous>, transform_indices = @transform_1, window_bounds = array<i64: 4, 32>}, {pipeline_mode = #tpu.pipeline_mode<synchronous>, transform_indices = @transform_2, window_bounds = array<i64: 4, 1>}, {transform_indices = @transform_3, window_bounds = array<i64: 4, 128>}]} {
    %c0 = arith.constant 0 : index
    %c0_0 = arith.constant 0 : index
    %0 = vector.load %arg1[%c0, %c0_0] : memref<128x32xf32, #tpu.memory_space<vmem>>, vector<128x32xf32>
    %c0_1 = arith.constant 0 : index
    %c0_2 = arith.constant 0 : index
    %1 = vector.load %arg2[%c0_1, %c0_2] : memref<4x32xf32, #tpu.memory_space<vmem>>, vector<4x32xf32>
    %cst = arith.constant dense<0.000000e+00> : vector<4x128xf32>
    %2 = tpu.matmul %1, %0, %cst {dimension_numbers = #tpu.dot_dimension_numbers<[1], [1], [0], [0], [0, 0, 1, 0], [], []>} : vector<4x32xf32>, vector<128x32xf32>, vector<4x128xf32> -> vector<4x128xf32>
    %c0_3 = arith.constant 0 : index
    %c0_4 = arith.constant 0 : index
    %3 = vector.load %arg3[%c0_3, %c0_4] : memref<4x1xf32, #tpu.memory_space<vmem>>, vector<4x1xf32>
    %4 = vector.broadcast %3 : vector<4x1xf32> to vector<4x128xf32>
    %5 = arith.addf %2, %4 : vector<4x128xf32>
    %6 = arith.negf %5 : vector<4x128xf32>
    %7 = math.exp %6 : vector<4x128xf32>
    %cst_5 = arith.constant 1.000000e+00 : f32
    %8 = vector.broadcast %cst_5 : f32 to vector<4x128xf32>
    %9 = arith.addf %8, %7 : vector<4x128xf32>
    %10 = arith.divf %8, %9 : vector<4x128xf32>
    %c0_6 = arith.constant 0 : index
    %c0_7 = arith.constant 0 : index
    %11 = vector.load %arg4[%c0_6, %c0_7] : memref<4x128xf32, #tpu.memory_space<vmem>>, vector<4x128xf32>
    tpu.vector_store %arg4[%c0_6, %c0_7], %10 {strides = array<i32>} : memref<4x128xf32, #tpu.memory_space<vmem>>, vector<4x128xf32>,
    return
  }
  func.func @transform_0(%arg0: i32) -> (i32, i32) {
    %c0_i32 = arith.constant 0 : i32
    %c0_i32_0 = arith.constant 0 : i32
    return %arg0, %c0_i32 : i32, i32
  }
  func.func @transform_1(%arg0: i32) -> (i32, i32) {
    %c0_i32 = arith.constant 0 : i32
    %c0_i32_0 = arith.constant 0 : i32
    %c0_i32_1 = arith.constant 0 : i32
    return %c0_i32, %c0_i32_0 : i32, i32
  }
  func.func @transform_2(%arg0: i32) -> (i32, i32) {
    %c0_i32 = arith.constant 0 : i32
    %c0_i32_0 = arith.constant 0 : i32
    %c0_i32_1 = arith.constant 0 : i32
    return %c0_i32, %c0_i32_0 : i32, i32
  }
  func.func @transform_3(%arg0: i32) -> (i32, i32) {
    %c0_i32 = arith.constant 0 : i32
    %c0_i32_0 = arith.constant 0 : i32
    return %c0_i32, %arg0 : i32, i32
  }
}

</mosaic_0001>

<bundles_post_ra>
// kernel: tpu_custom_call.1
= control target key start
LH: loop header
LB: loop body
LE: loop exit
PB: predicated region body
PF: predicated region fallthrough
CT: control target
= control target key end

     0   :  { %vm38_vm0 = vcmask 261120   ;;  %v282_v1 = vmov 0.0   ;;  %vm283_vm1 = vmmov 0   ;;  %v284_v2 = vmov 0   ;;  %s380_s0 = inlined_call_operand.vmem [shape: f32[128,32], index: 0, kind: input, shape index: {}]   ;;  %s381_s1 = inlined_call_operand.vmem [shape: f32[4,32], index: 1, kind: input, shape index: {}]   ;;  %s382_s2 = inlined_call_operand.vmem [shape: f32[4,1], index: 2, kind: input, shape index: {}]   ;;  %s383_s3 = inlined_call_operand.hbm [shape: f32[4,128], index: 3, kind: output, shape index: {}]  }
   0x1   :  { %v30_v0 = vld [vmem:[%s380_s0 + $0x78] sm:$0xff]  ;;  %216 = vmatprep.subr.mxu0 %v282_v1  ;;  %248 = vmatprep.mubr.msk.f32.mxu0 %vm283_vm1, %v282_v1  ;;  %v29_v3 = vld [vmem:[%s380_s0 + $0x70] sm:$0xff]  ;;  %v32_v4 = vld [vmem:[%s382_s2] sm:$0xf] }
   0x2   :  { %217 = vmatpush3.xpose.msk.msra.mxu0 %vm38_vm0, %v30_v0  ;;  %255 = vset.pattern.permute.xlu0 %v284_v2 }
   0x3   :  { %218 = vmatprep.subr.mxu0 %v282_v1  ;;  %35 = vperm.xlu0 %255, %v32_v4  }
   0x6   :  { %219 = vmatpush3.xpose.msk.msra.mxu0 %vm38_vm0, %v29_v3 }
   0x7   :  { %8 = vsyncpa [#allocation3], 0  ;;  %220 = vmatprep.subr.mxu0 %v282_v1  ;;  %v28_v5 = vld [vmem:[%s380_s0 + $0x68] sm:$0xff]  ;;  %v27_v6 = vld [vmem:[%s380_s0 + $0x60] sm:$0xff]  ;;  %s285_s20 = smov [#allocation2]  }
   0x8   :  { %v26_v7 = vld [vmem:[%s380_s0 + $0x58] sm:$0xff]  ;;  %v25_v8 = vld [vmem:[%s380_s0 + $0x50] sm:$0xff]  ;;  %v24_v9 = vld [vmem:[%s380_s0 + $0x48] sm:$0xff]  ;;  %s173_s21 = sshll.u32 %s285_s20, 4  ;;  %s174_s21 = int_to_ptr.vmem [resolvable:$true] %s173_s21 }
   0x9   :  { %v23_v10 = vld [vmem:[%s380_s0 + $0x40] sm:$0xff]  ;;  %v22_v11 = vld [vmem:[%s380_s0 + $0x38] sm:$0xff]  ;;  %v21_v12 = vld [vmem:[%s380_s0 + $0x30] sm:$0xff]  ;;  %p265_p1 = scmp.lt.s32.totalorder %s174_s21, %s174_s21 }
   0xa   :  { %221 = vmatpush3.xpose.msk.msra.mxu0 %vm38_vm0, %v28_v5  ;;  %v20_v13 = vld [vmem:[%s380_s0 + $0x28] sm:$0xff]  ;;  %v19_v14 = vld [vmem:[%s380_s0 + $0x20] sm:$0xff]  ;;  %v18_v15 = vld [vmem:[%s380_s0 + $0x18] sm:$0xff] }
   0xb   :  { %222 = vmatprep.subr.mxu0 %v282_v1  ;;  %v17_v16 = vld [vmem:[%s380_s0 + $0x10] sm:$0xff]  ;;  %v16_v17 = vld [vmem:[%s380_s0 + $0x8] sm:$0xff]  ;;  %v15_v18 = vld [vmem:[%s380_s0] sm:$0xff]  ;;  %s260_s0 = scalar_lea.vmem %s174_s21, 64 }
   0xc   :  { %v31_v19 = vld [vmem:[%s381_s1] sm:$0xf]  ;;  %p261_p0 = scmp.ne.s32.totalorder %s174_s21, %s260_s0  ;;  %p266_p2 = scmp.lt.s32.totalorder %s260_s0, %s260_s0 }
   0xe   :  { %223 = vmatpush3.xpose.msk.msra.mxu0 %vm38_vm0, %v27_v6  ;;  %p267_p3 = por %p266_p2, %p265_p1 }
   0xf   :  { %224 = vmatprep.subr.mxu0 %v282_v1 }
  0x10   :  { %p268_p4 = pnand %p267_p3, %p261_p0 }
  0x12   :  { %225 = vmatpush3.xpose.msk.msra.mxu0 %vm38_vm0, %v26_v7 }
  0x13   :  { %226 = vmatprep.subr.mxu0 %v282_v1 }
  0x16   :  { %227 = vmatpush3.xpose.msk.msra.mxu0 %vm38_vm0, %v25_v8 }
  0x17   :  { %228 = vmatprep.subr.mxu0 %v282_v1 }
  0x1a   :  { %229 = vmatpush3.xpose.msk.msra.mxu0 %vm38_vm0, %v24_v9 }
  0x1b   :  { %230 = vmatprep.subr.mxu0 %v282_v1 }
  0x1e   :  { %231 = vmatpush3.xpose.msk.msra.mxu0 %vm38_vm0, %v23_v10 }
  0x1f   :  { %232 = vmatprep.subr.mxu0 %v282_v1 }
  0x22   :  { %233 = vmatpush3.xpose.msk.msra.mxu0 %vm38_vm0, %v22_v11 }
  0x23   :  { %234 = vmatprep.subr.mxu0 %v282_v1 }
  0x26   :  { %235 = vmatpush3.xpose.msk.msra.mxu0 %vm38_vm0, %v21_v12 }
  0x27   :  { %236 = vmatprep.subr.mxu0 %v282_v1 }
  0x2a   :  { %237 = vmatpush3.xpose.msk.msra.mxu0 %vm38_vm0, %v20_v13 }
  0x2b   :  { %238 = vmatprep.subr.mxu0 %v282_v1 }
  0x2e   :  { %239 = vmatpush3.xpose.msk.msra.mxu0 %vm38_vm0, %v19_v14 }
  0x2f   :  { %240 = vmatprep.subr.mxu0 %v282_v1 }
  0x32   :  { %241 = vmatpush3.xpose.msk.msra.mxu0 %vm38_vm0, %v18_v15 }
  0x33   :  { %242 = vmatprep.subr.mxu0 %v282_v1 }
  0x36   :  { %243 = vmatpush3.xpose.msk.msra.mxu0 %vm38_vm0, %v17_v16 }
  0x37   :  { %244 = vmatprep.subr.mxu0 %v282_v1 }
  0x3a   :  { %245 = vmatpush3.xpose.msk.msra.mxu0 %vm38_vm0, %v16_v17 }
  0x3b   :  { %246 = vmatprep.subr.mxu0 %v282_v1 }
  0x3e   :  { %247 = vmatpush3.xpose.msk.msra.mxu0 %vm38_vm0, %v15_v18 }
  0x41   :  { %249 = vmatmul.mubr.msk.f32.vlgmr.msra.gmra.mxu0 %vm38_vm0, %v31_v19 }
  0x7e   :  { %v36_v20 = vpop.permute.xlu0 %35 }
 0x101   :  { %v156_v21 = vpop.f32.mrf.mxu0 }
 0x102   :  { %v157_v22 = vadd.f32 %v156_v21, %v36_v20 }
 0x103   :  { %v250_v23 = vpop.f32.mrf.mxu0 }
 0x104   :  { %v198_v24 = vmul.f32 -1.442695, %v157_v22 }
 0x106   :  { %256 = vpow2.f32 %v198_v24 }
 0x113   :  { %v257_v25 = vpop.eup %256 }
 0x114   :  { %v163_v26 = vadd.f32 1.0, %v257_v25 }
 0x116   :  { %258 = vrcp.f32 %v163_v26 }
 0x123   :  { %v259_v27 = vpop.eup %258 }
 0x124   :  { %166 = vst [vmem:[#allocation2] sm:$0xf] %v259_v27 }
 0x125   :  { %271 = shalt.err (!%p268_p4)
}
 0x126   :  { %176 = dma.vmem_to_hbm [thread:$0]  %s174_s21, 64, %s383_s3, [#allocation3]  }
 0x127   :  { %280 = dma.done.wait [#allocation3], 64  }
 0x128   :  { %281 = vsyncadd [#allocation3], 4294967232 }
 0x129   :  { %180 = vsyncpa [#allocation3], 1 }

</bundles_post_ra>
